<compile_context>
chip_gen: v5e
topology: v5e:2x2
jax: 0.10.0
libtpu: 0.0.40
codegen_flags: <defaults>
</compile_context>

<pallas_src>
import jax
import jax.numpy as jnp
from jax.experimental import pallas as pl
from jax.experimental.pallas import tpu as pltpu

LANE = 128
SUBLANE = 8
TM_MAX = 2048  # batch tile cap; sweep 1024-4096 on real workloads


def _round_up(x, m):
    return ((x + m - 1) // m) * m


def mlp_kernel(x_ref,
               w1_ref, b1_ref,
               w2_ref, b2_ref,
               w3_ref, b3_ref,
               w4_ref, b4_ref,
               out_ref):
    # x is already bf16 (streamed that way); dot operands are bf16 for the
    # native MXU path, accumulation is f32, bias-add/ReLU stay f32 (v5e-safe).
    x = x_ref[...]

    h = jnp.dot(x, w1_ref[...], preferred_element_type=jnp.float32) + b1_ref[...]
    h = jnp.maximum(h, 0.0)

    h = jnp.dot(h.astype(jnp.bfloat16), w2_ref[...],
                preferred_element_type=jnp.float32) + b2_ref[...]
    h = jnp.maximum(h, 0.0)

    h = jnp.dot(h.astype(jnp.bfloat16), w3_ref[...],
                preferred_element_type=jnp.float32) + b3_ref[...]
    h = jnp.maximum(h, 0.0)

    q = jnp.dot(h.astype(jnp.bfloat16), w4_ref[...],
                preferred_element_type=jnp.float32) + b4_ref[...]
    out_ref[...] = q.astype(out_ref.dtype)


def network_forward(state, params, nb_action, tm_max=TM_MAX):
    """state: (batch, input_size) f32/bf16. params: dict from pad_params()."""
    batch, input_size = state.shape
    h1 = params["w1"].shape[1]
    h2 = params["w2"].shape[1]
    h3 = params["w3"].shape[1]
    out_dim = params["w4"].shape[1]          # == nb_action (unpadded)

    # Pad batch only to the 8-row sublane; let pl.cdiv handle a ragged last
    # tile (row-wise-independent math, so OOB rows never contaminate output).
    padded_batch = _round_up(batch, SUBLANE)
    if padded_batch <= SUBLANE:
        tm = padded_batch
    else:
        # >=2 grid steps when possible so v7x's second TensorCore gets work.
        tm = min(tm_max, _round_up(pl.cdiv(padded_batch, 2), SUBLANE))
    grid = pl.cdiv(padded_batch, tm)

    # Stream activations in bf16 (halves x HBM bytes; MXU operand is bf16 anyway).
    x = state.astype(jnp.bfloat16)
    if padded_batch != batch:
        x = jnp.pad(x, ((0, padded_batch - batch), (0, 0)))

    def resident(shape):
        # Weights/biases: same block every grid step -> stays VMEM-resident.
        return pl.BlockSpec(shape, lambda i: (0, 0))

    out = pl.pallas_call(
        mlp_kernel,
        out_shape=jax.ShapeDtypeStruct((padded_batch, out_dim), jnp.float32),
        grid=(grid,),
        in_specs=[
            pl.BlockSpec((tm, input_size), lambda i: (i, 0)),  # x tiled over batch
            resident((input_size, h1)), resident((1, h1)),
            resident((h1, h2)),         resident((1, h2)),
            resident((h2, h3)),         resident((1, h3)),
            resident((h3, out_dim)),    resident((1, out_dim)),
        ],
        out_specs=pl.BlockSpec((tm, out_dim), lambda i: (i, 0)),
        compiler_params=pltpu.CompilerParams(
            dimension_semantics=("parallel",)),
    )(x,
      params["w1"], params["b1"],
      params["w2"], params["b2"],
      params["w3"], params["b3"],
      params["w4"], params["b4"])

    if padded_batch != batch:
        out = out[:batch]
    return out


def init_params(key, input_size, nb_action):
    """Deterministic synthetic init matching nn.Linear shapes (pre-transposed to (in, out))."""
    dims = [(input_size, 128), (128, 60), (60, 30), (30, nb_action)]
    params = {}
    for i, (fin, fout) in enumerate(dims, start=1):
        key, kw, kb = jax.random.split(key, 3)
        bound = 1.0 / (fin ** 0.5)  # same scale rule as PyTorch's default Linear init
        params[f"w{i}"] = jax.random.uniform(kw, (fin, fout), jnp.float32, -bound, bound)
        params[f"b{i}"] = jax.random.uniform(kb, (1, fout), jnp.float32, -bound, bound)
    return params


def pad_params(params):
    """Pad only the hidden feature dims to 128 lanes (weights are VMEM-resident,
    so this costs no per-tile HBM traffic); input feature dim and nb_action
    stay unpadded so the streamed x / q tensors carry no wasted lanes.
    Weights -> bf16, biases stay f32. Padded rows/cols/bias lanes are zero."""
    w1, w2, w3, w4 = params["w1"], params["w2"], params["w3"], params["w4"]
    b1, b2, b3, b4 = params["b1"], params["b2"], params["b3"], params["b4"]
    in_dim = w1.shape[0]
    h1p = _round_up(w1.shape[1], LANE)
    h2p = _round_up(w2.shape[1], LANE)
    h3p = _round_up(w3.shape[1], LANE)
    out_dim = w4.shape[1]

    def pad_w(w, rows, cols):
        wp = jnp.zeros((rows, cols), jnp.float32).at[:w.shape[0], :w.shape[1]].set(w)
        return wp.astype(jnp.bfloat16)

    def pad_b(b, cols):
        return jnp.zeros((1, cols), jnp.float32).at[:, :b.shape[1]].set(b)

    return {
        "w1": pad_w(w1, in_dim, h1p), "b1": pad_b(b1, h1p),
        "w2": pad_w(w2, h1p, h2p),    "b2": pad_b(b2, h2p),
        "w3": pad_w(w3, h2p, h3p),    "b3": pad_b(b3, h3p),
        "w4": pad_w(w4, h3p, out_dim), "b4": pad_b(b4, out_dim),
    }


def reference_forward(state, params, nb_action):
    """Pure-JAX reference mirroring the kernel math (bf16 operands, f32 accum).
    Note: this validates the bf16-weight kernel math, not the original f32
    PyTorch weights (bf16 rounding ~3 significant digits, fine for DQN)."""
    x = state.astype(jnp.bfloat16)
    h = jnp.maximum(jnp.dot(x, params["w1"],
                            preferred_element_type=jnp.float32) + params["b1"], 0.0)
    h = jnp.maximum(jnp.dot(h.astype(jnp.bfloat16), params["w2"],
                            preferred_element_type=jnp.float32) + params["b2"], 0.0)
    h = jnp.maximum(jnp.dot(h.astype(jnp.bfloat16), params["w3"],
                            preferred_element_type=jnp.float32) + params["b3"], 0.0)
    q = jnp.dot(h.astype(jnp.bfloat16), params["w4"],
                preferred_element_type=jnp.float32) + params["b4"]
    return q[:, :nb_action]


if __name__ == "__main__":
    key = jax.random.PRNGKey(0)
    batch, input_size, nb_action = 2, 16, 8

    key, kx = jax.random.split(key)
    state = jax.random.normal(kx, (batch, input_size), jnp.float32)
    params = pad_params(init_params(key, input_size, nb_action))

    q_values = network_forward(state, params, nb_action)
    q_values = jax.block_until_ready(q_values)

    ref = reference_forward(state, params, nb_action)
    assert q_values.shape == (batch, nb_action)
    assert jnp.allclose(q_values, ref, atol=1e-3, rtol=1e-3), "mismatch vs reference"

    print("KERNEL_OK")
</pallas_src>

<mosaic_0001>
module attributes {stable_mosaic.version = 11 : i64} {
  func.func @mlp_kernel(%arg0: i32, %arg1: memref<8x16xbf16, #tpu.memory_space<vmem>>, %arg2: memref<16x128xbf16, #tpu.memory_space<vmem>>, %arg3: memref<1x128xf32, #tpu.memory_space<vmem>>, %arg4: memref<128x128xbf16, #tpu.memory_space<vmem>>, %arg5: memref<1x128xf32, #tpu.memory_space<vmem>>, %arg6: memref<128x128xbf16, #tpu.memory_space<vmem>>, %arg7: memref<1x128xf32, #tpu.memory_space<vmem>>, %arg8: memref<128x8xbf16, #tpu.memory_space<vmem>>, %arg9: memref<1x8xf32, #tpu.memory_space<vmem>>, %arg10: memref<8x8xf32, #tpu.memory_space<vmem>>) attributes {dimension_semantics = [#tpu.dimension_semantics<parallel>], iteration_bounds = array<i64: 1>, scalar_prefetch = 0 : i64, scratch_operands = 0 : i64, tpu.core_type = #tpu.core_type<tc>, window_params = [{transform_indices = @transform_0, window_bounds = array<i64: 8, 16>}, {pipeline_mode = #tpu.pipeline_mode<synchronous>, transform_indices = @transform_1, window_bounds = array<i64: 16, 128>}, {pipeline_mode = #tpu.pipeline_mode<synchronous>, transform_indices = @transform_2, window_bounds = array<i64: 1, 128>}, {pipeline_mode = #tpu.pipeline_mode<synchronous>, transform_indices = @transform_3, window_bounds = array<i64: 128, 128>}, {pipeline_mode = #tpu.pipeline_mode<synchronous>, transform_indices = @transform_4, window_bounds = array<i64: 1, 128>}, {pipeline_mode = #tpu.pipeline_mode<synchronous>, transform_indices = @transform_5, window_bounds = array<i64: 128, 128>}, {pipeline_mode = #tpu.pipeline_mode<synchronous>, transform_indices = @transform_6, window_bounds = array<i64: 1, 128>}, {pipeline_mode = #tpu.pipeline_mode<synchronous>, transform_indices = @transform_7, window_bounds = array<i64: 128, 8>}, {pipeline_mode = #tpu.pipeline_mode<synchronous>, transform_indices = @transform_8, window_bounds = array<i64: 1, 8>}, {transform_indices = @transform_9, window_bounds = array<i64: 8, 8>}]} {
    %c0 = arith.constant 0 : index
    %c0_0 = arith.constant 0 : index
    %0 = vector.load %arg1[%c0, %c0_0] : memref<8x16xbf16, #tpu.memory_space<vmem>>, vector<8x16xbf16>
    %c0_1 = arith.constant 0 : index
    %c0_2 = arith.constant 0 : index
    %1 = vector.load %arg2[%c0_1, %c0_2] : memref<16x128xbf16, #tpu.memory_space<vmem>>, vector<16x128xbf16>
    %cst = arith.constant dense<0.000000e+00> : vector<8x128xf32>
    %2 = tpu.matmul %0, %1, %cst {dimension_numbers = #tpu.dot_dimension_numbers<[1], [0], [0], [1], [0, 0, 1, 1], [], []>} : vector<8x16xbf16>, vector<16x128xbf16>, vector<8x128xf32> -> vector<8x128xf32>
    %c0_3 = arith.constant 0 : index
    %c0_4 = arith.constant 0 : index
    %3 = vector.load %arg3[%c0_3, %c0_4] : memref<1x128xf32, #tpu.memory_space<vmem>>, vector<1x128xf32>
    %4 = vector.broadcast %3 : vector<1x128xf32> to vector<8x128xf32>
    %5 = arith.addf %2, %4 : vector<8x128xf32>
    %cst_5 = arith.constant 0.000000e+00 : f32
    %6 = vector.broadcast %cst_5 : f32 to vector<8x128xf32>
    %7 = arith.maximumf %5, %6 : vector<8x128xf32>
    %8 = arith.truncf %7 : vector<8x128xf32> to vector<8x128xbf16>
    %c0_6 = arith.constant 0 : index
    %c0_7 = arith.constant 0 : index
    %9 = vector.load %arg4[%c0_6, %c0_7] : memref<128x128xbf16, #tpu.memory_space<vmem>>, vector<128x128xbf16>
    %cst_8 = arith.constant dense<0.000000e+00> : vector<8x128xf32>
    %10 = tpu.matmul %8, %9, %cst_8 {dimension_numbers = #tpu.dot_dimension_numbers<[1], [0], [0], [1], [0, 0, 1, 1], [], []>} : vector<8x128xbf16>, vector<128x128xbf16>, vector<8x128xf32> -> vector<8x128xf32>
    %c0_9 = arith.constant 0 : index
    %c0_10 = arith.constant 0 : index
    %11 = vector.load %arg5[%c0_9, %c0_10] : memref<1x128xf32, #tpu.memory_space<vmem>>, vector<1x128xf32>
    %12 = vector.broadcast %11 : vector<1x128xf32> to vector<8x128xf32>
    %13 = arith.addf %10, %12 : vector<8x128xf32>
    %cst_11 = arith.constant 0.000000e+00 : f32
    %14 = vector.broadcast %cst_11 : f32 to vector<8x128xf32>
    %15 = arith.maximumf %13, %14 : vector<8x128xf32>
    %16 = arith.truncf %15 : vector<8x128xf32> to vector<8x128xbf16>
    %c0_12 = arith.constant 0 : index
    %c0_13 = arith.constant 0 : index
    %17 = vector.load %arg6[%c0_12, %c0_13] : memref<128x128xbf16, #tpu.memory_space<vmem>>, vector<128x128xbf16>
    %cst_14 = arith.constant dense<0.000000e+00> : vector<8x128xf32>
    %18 = tpu.matmul %16, %17, %cst_14 {dimension_numbers = #tpu.dot_dimension_numbers<[1], [0], [0], [1], [0, 0, 1, 1], [], []>} : vector<8x128xbf16>, vector<128x128xbf16>, vector<8x128xf32> -> vector<8x128xf32>
    %c0_15 = arith.constant 0 : index
    %c0_16 = arith.constant 0 : index
    %19 = vector.load %arg7[%c0_15, %c0_16] : memref<1x128xf32, #tpu.memory_space<vmem>>, vector<1x128xf32>
    %20 = vector.broadcast %19 : vector<1x128xf32> to vector<8x128xf32>
    %21 = arith.addf %18, %20 : vector<8x128xf32>
    %cst_17 = arith.constant 0.000000e+00 : f32
    %22 = vector.broadcast %cst_17 : f32 to vector<8x128xf32>
    %23 = arith.maximumf %21, %22 : vector<8x128xf32>
    %24 = arith.truncf %23 : vector<8x128xf32> to vector<8x128xbf16>
    %c0_18 = arith.constant 0 : index
    %c0_19 = arith.constant 0 : index
    %25 = vector.load %arg8[%c0_18, %c0_19] : memref<128x8xbf16, #tpu.memory_space<vmem>>, vector<128x8xbf16>
    %cst_20 = arith.constant dense<0.000000e+00> : vector<8x8xf32>
    %26 = tpu.matmul %24, %25, %cst_20 {dimension_numbers = #tpu.dot_dimension_numbers<[1], [0], [0], [1], [0, 0, 1, 1], [], []>} : vector<8x128xbf16>, vector<128x8xbf16>, vector<8x8xf32> -> vector<8x8xf32>
    %c0_21 = arith.constant 0 : index
    %c0_22 = arith.constant 0 : index
    %27 = vector.load %arg9[%c0_21, %c0_22] : memref<1x8xf32, #tpu.memory_space<vmem>>, vector<1x8xf32>
    %28 = vector.broadcast %27 : vector<1x8xf32> to vector<8x8xf32>
    %29 = arith.addf %26, %28 : vector<8x8xf32>
    %c0_23 = arith.constant 0 : index
    %c0_24 = arith.constant 0 : index
    %30 = vector.load %arg10[%c0_23, %c0_24] : memref<8x8xf32, #tpu.memory_space<vmem>>, vector<8x8xf32>
    tpu.vector_store %arg10[%c0_23, %c0_24], %29 {strides = array<i32>} : memref<8x8xf32, #tpu.memory_space<vmem>>, vector<8x8xf32>,
    return
  }
  func.func @transform_0(%arg0: i32) -> (i32, i32) {
    %c0_i32 = arith.constant 0 : i32
    %c0_i32_0 = arith.constant 0 : i32
    return %arg0, %c0_i32 : i32, i32
  }
  func.func @transform_1(%arg0: i32) -> (i32, i32) {
    %c0_i32 = arith.constant 0 : i32
    %c0_i32_0 = arith.constant 0 : i32
    %c0_i32_1 = arith.constant 0 : i32
    return %c0_i32, %c0_i32_0 : i32, i32
  }
  func.func @transform_2(%arg0: i32) -> (i32, i32) {
    %c0_i32 = arith.constant 0 : i32
    %c0_i32_0 = arith.constant 0 : i32
    %c0_i32_1 = arith.constant 0 : i32
    return %c0_i32, %c0_i32_0 : i32, i32
  }
  func.func @transform_3(%arg0: i32) -> (i32, i32) {
    %c0_i32 = arith.constant 0 : i32
    %c0_i32_0 = arith.constant 0 : i32
    %c0_i32_1 = arith.constant 0 : i32
    return %c0_i32, %c0_i32_0 : i32, i32
  }
  func.func @transform_4(%arg0: i32) -> (i32, i32) {
    %c0_i32 = arith.constant 0 : i32
    %c0_i32_0 = arith.constant 0 : i32
    %c0_i32_1 = arith.constant 0 : i32
    return %c0_i32, %c0_i32_0 : i32, i32
  }
  func.func @transform_5(%arg0: i32) -> (i32, i32) {
    %c0_i32 = arith.constant 0 : i32
    %c0_i32_0 = arith.constant 0 : i32
    %c0_i32_1 = arith.constant 0 : i32
    return %c0_i32, %c0_i32_0 : i32, i32
  }
  func.func @transform_6(%arg0: i32) -> (i32, i32) {
    %c0_i32 = arith.constant 0 : i32
    %c0_i32_0 = arith.constant 0 : i32
    %c0_i32_1 = arith.constant 0 : i32
    return %c0_i32, %c0_i32_0 : i32, i32
  }
  func.func @transform_7(%arg0: i32) -> (i32, i32) {
    %c0_i32 = arith.constant 0 : i32
    %c0_i32_0 = arith.constant 0 : i32
    %c0_i32_1 = arith.constant 0 : i32
    return %c0_i32, %c0_i32_0 : i32, i32
  }
  func.func @transform_8(%arg0: i32) -> (i32, i32) {
    %c0_i32 = arith.constant 0 : i32
    %c0_i32_0 = arith.constant 0 : i32
    %c0_i32_1 = arith.constant 0 : i32
    return %c0_i32, %c0_i32_0 : i32, i32
  }
  func.func @transform_9(%arg0: i32) -> (i32, i32) {
    %c0_i32 = arith.constant 0 : i32
    %c0_i32_0 = arith.constant 0 : i32
    return %arg0, %c0_i32 : i32, i32
  }
}

</mosaic_0001>

<bundles_post_ra>
// kernel: tpu_custom_call.1
= control target key start
LH: loop header
LB: loop body
LE: loop exit
PB: predicated region body
PF: predicated region fallthrough
CT: control target
= control target key end

     0   :  { %14 = vsyncpa [#allocation3], 0  ;;  %s744_s0 = inlined_call_operand.vmem [shape: bf16[8,16], index: 0, kind: input, shape index: {}]   ;;  %s745_s1 = inlined_call_operand.hbm [shape: bf16[16,128], index: 1, kind: input, shape index: {}]   ;;  %s746_s2 = inlined_call_operand.vmem [shape: f32[1,128], index: 2, kind: input, shape index: {}]   ;;  %s747_s3 = inlined_call_operand.vmem [shape: bf16[128,128], index: 3, kind: input, shape index: {}]   ;;  %s748_s4 = inlined_call_operand.vmem [shape: f32[1,128], index: 4, kind: input, shape index: {}]   ;;  %s749_s5 = inlined_call_operand.hbm [shape: bf16[128,128], index: 5, kind: input, shape index: {}]   ;;  %s750_s6 = inlined_call_operand.hbm [shape: f32[1,128], index: 6, kind: input, shape index: {}]   ;;  %s751_s7 = inlined_call_operand.vmem [shape: bf16[128,8], index: 7, kind: input, shape index: {}]   ;;  %s752_s8 = inlined_call_operand.vmem [shape: f32[1,8], index: 8, kind: input, shape index: {}]   ;;  %s753_s9 = inlined_call_operand.hbm [shape: f32[8,8], index: 9, kind: output, shape index: {}]  }
   0x1   :  { %15 = vsyncpa [#allocation6], 0 }
   0x2   :  { %16 = vsyncpa [#allocation4], 0  ;;  %s42_s11 = sshll.u32 %s749_s5, 4  ;;  %s616_s12 = smov [#allocation5]   ;;  %s43_s11 = int_to_ptr.hbm [resolvable:$true] %s42_s11 }
   0x3   :  { %s44_s13 = sshll.u32 %s616_s12, 4  ;;  %s23_s16 = sshll.u32 %s745_s1, 4  ;;  %s45_s13 = int_to_ptr.vmem [resolvable:$true] %s44_s13  ;;  %s24_s16 = int_to_ptr.hbm [resolvable:$true] %s23_s16 }
   0x4   :  { %s617_s17 = smov 64   ;;  %s618_s18 = smov 4  }
   0x5   :  { %50 = dma.hbm_to_vmem [thread:$0]  %s43_s11, 1024, %s45_s13, [#allocation6], %s617_s17, %s617_s17, %s618_s18  }
   0x6   :  { %s619_s19 = smov [#allocation2]   ;;  %s56_s23 = sshll.u32 %s750_s6, 4  ;;  %s57_s23 = int_to_ptr.hbm [resolvable:$true] %s56_s23 }
   0x7   :  { %s25_s20 = sshll.u32 %s619_s19, 4  ;;  %s620_s5 = smov [#allocation7]   ;;  %s26_s20 = int_to_ptr.vmem [resolvable:$true] %s25_s20 }
   0x8   :  { %31 = dma.hbm_to_vmem [thread:$0]  %s24_s16, 128, %s26_s20, [#allocation3], %s617_s17, %s617_s17, %s618_s18  }
   0x9   :  { %s58_s24 = sshll.u32 %s620_s5, 4  ;;  %s59_s24 = int_to_ptr.vmem [resolvable:$true] %s58_s24 }
   0xa   :  { %61 = dma.hbm_to_vmem [thread:$0]  %s57_s23, 16, %s59_s24, [#allocation6]  }
   0xb   :  { %610 = dma.done.wait [#allocation3], 128  }
   0xc   :  { %611 = vsyncadd [#allocation3], 4294967168 }
   0xd   :  { %612 = dma.done.wait [#allocation6], 1040  }
   0xe   :  { %613 = vsyncadd [#allocation6], 4294966256  ;;  %v479_v0 = vld [vmem:[#allocation2] sm:$0xff]  ;;  %v487_v1 = vld [vmem:[%s747_s3 + $0x38] sm:$0xff]  ;;  %vm92_vm0 = vcmask 130048   ;;  %s621_s13 = smov [#allocation8]  }
   0xf   :  { %103 = vmatpush.bf16.msra.mxu0 %v479_v0  ;;  %v79_v2 = vld [vmem:[%s744_s0] sm:$0xf]  ;;  %179 = vmatpush.bf16.msra.mxu1 %v487_v1  ;;  %v486_v3 = vld [vmem:[%s747_s3 + $0x30] sm:$0xff]  ;;  %v485_v4 = vld [vmem:[%s747_s3 + $0x28] sm:$0xff]  ;;  %s365_s14 = sshll.u32 %s621_s13, 4  ;;  %s367_s17 = sshll.u32 %s753_s9, 4  ;;  %s366_s14 = int_to_ptr.vmem [resolvable:$true] %s365_s14  ;;  %s368_s17 = int_to_ptr.hbm [resolvable:$true] %s367_s17 }
  0x10   :  { %v484_v5 = vld [vmem:[%s747_s3 + $0x20] sm:$0xff]  ;;  %v483_v6 = vld [vmem:[%s747_s3 + $0x18] sm:$0xff]  ;;  %v482_v7 = vld [vmem:[%s747_s3 + $0x10] sm:$0xff]  ;;  %vm358_vm1 = vcmask 64512  }
  0x11   :  { %v481_v8 = vld [vmem:[%s747_s3 + $0x8] sm:$0xff]  ;;  %v480_v9 = vld [vmem:[%s747_s3] sm:$0xff]  ;;  %v494_v11 = vld [vmem:[#allocation5 + $0x30] sm:$0xff] }
  0x12   :  { %382 = vmatmul.msk.bf16.vlgmr.msra.gmra.mxu0 %vm92_vm0, %v79_v2  ;;  %v495_v10 = vld [vmem:[#allocation5 + $0x38] sm:$0xff]  ;;  %v493_v12 = vld [vmem:[#allocation5 + $0x28] sm:$0xff]  ;;  %v492_v13 = vld [vmem:[#allocation5 + $0x20] sm:$0xff] }
  0x13   :  { %180 = vmatpush.bf16.msra.mxu1 %v486_v3  ;;  %262 = vmatpush.bf16.msra.mxu2 %v495_v10  ;;  %v491_v14 = vld [vmem:[#allocation5 + $0x18] sm:$0xff]  ;;  %v490_v15 = vld [vmem:[#allocation5 + $0x10] sm:$0xff]  ;;  %v489_v22 = vld [vmem:[#allocation5 + $0x8] sm:$0xff] }
  0x14   :  { %v510_v16 = vld [vmem:[%s746_s2] ss:$0 sm:$0xff]  ;;  %v488_v23 = vld [vmem:[#allocation5] sm:$0xff]  ;;  %v503_v24 = vld [vmem:[%s751_s7 + $0x38] sm:$0xff] }
  0x15   :  { %345 = vmatpush.bf16.msra.mxu3 %v503_v24  ;;  %v502_v25 = vld [vmem:[%s751_s7 + $0x30] sm:$0xff]  ;;  %v501_v26 = vld [vmem:[%s751_s7 + $0x28] sm:$0xff]  ;;  %v500_v27 = vld [vmem:[%s751_s7 + $0x20] sm:$0xff] }
  0x16   :  { %v499_v28 = vld [vmem:[%s751_s7 + $0x18] sm:$0xff]  ;;  %v498_v29 = vld [vmem:[%s751_s7 + $0x10] sm:$0xff]  ;;  %v511_v30 = vld [vmem:[%s748_s4] ss:$0 sm:$0xff] }
  0x17   :  { %181 = vmatpush.bf16.msra.mxu1 %v485_v4  ;;  %263 = vmatpush.bf16.msra.mxu2 %v494_v11  ;;  %v497_v36 = vld [vmem:[%s751_s7 + $0x8] sm:$0xff]  ;;  %v496_v37 = vld [vmem:[%s751_s7] sm:$0xff] }
  0x18   :  { %v512_v38 = vld [vmem:[#allocation7] ss:$0 sm:$0xff]  ;;  %v513_v44 = vld [vmem:[%s752_s8] ss:$0 sm:$0xff] }
  0x19   :  { %346 = vmatpush.bf16.msra.mxu3 %v502_v25 }
  0x1b   :  { %182 = vmatpush.bf16.msra.mxu1 %v484_v5  ;;  %264 = vmatpush.bf16.msra.mxu2 %v493_v12 }
  0x1d   :  { %347 = vmatpush.bf16.msra.mxu3 %v501_v26 }
  0x1f   :  { %183 = vmatpush.bf16.msra.mxu1 %v483_v6  ;;  %265 = vmatpush.bf16.msra.mxu2 %v492_v13 }
  0x21   :  { %348 = vmatpush.bf16.msra.mxu3 %v500_v27 }
  0x23   :  { %184 = vmatpush.bf16.msra.mxu1 %v482_v7  ;;  %266 = vmatpush.bf16.msra.mxu2 %v491_v14 }
  0x25   :  { %349 = vmatpush.bf16.msra.mxu3 %v499_v28 }
  0x27   :  { %185 = vmatpush.bf16.msra.mxu1 %v481_v8  ;;  %267 = vmatpush.bf16.msra.mxu2 %v490_v15 }
  0x29   :  { %350 = vmatpush.bf16.msra.mxu3 %v498_v29 }
  0x2b   :  { %186 = vmatpush.bf16.msra.mxu1 %v480_v9  ;;  %268 = vmatpush.bf16.msra.mxu2 %v489_v22 }
  0x2d   :  { %351 = vmatpush.bf16.msra.mxu3 %v497_v36 }
  0x2f   :  { %269 = vmatpush.bf16.msra.mxu2 %v488_v23 }
  0x31   :  { %352 = vmatpush.bf16.msra.mxu3 %v496_v37 }
  0x8f   :  { %v105_v17 = vpop.f32.mrf.mxu0 }
  0x90   :  { %v106_v18 = vadd.f32 %v510_v16, %v105_v17 }
  0x92   :  { %v109_v19 = vmax.f32 %v106_v18, 0.0 }
  0x94   :  { %v110_v20 = vpack.c.bf16 %v109_v19, %v109_v19 }
  0x96   :  { %187 = vmatmul.bf16.vlgmr.msra.gmra.mxu1 %v110_v20 }
  0x97   :  { %v107_v21 = vpop.f32.mrf.mxu0 }
 0x113   :  { %v188_v31 = vpop.f32.mrf.mxu1 }
 0x114   :  { %v189_v32 = vadd.f32 %v511_v30, %v188_v31 }
 0x116   :  { %v192_v33 = vmax.f32 %v189_v32, 0.0 }
 0x118   :  { %v193_v34 = vpack.c.bf16 %v192_v33, %v192_v33 }
 0x11a   :  { %270 = vmatmul.bf16.vlgmr.msra.gmra.mxu2 %v193_v34 }
 0x11b   :  { %v190_v35 = vpop.f32.mrf.mxu1 }
 0x19d   :  { %v271_v39 = vpop.f32.mrf.mxu2 }
 0x19e   :  { %v272_v40 = vadd.f32 %v512_v38, %v271_v39 }
 0x1a0   :  { %v275_v41 = vmax.f32 %v272_v40, 0.0 }
 0x1a2   :  { %v276_v42 = vpack.c.bf16 %v275_v41, %v275_v41 }
 0x1a4   :  { %353 = vmatmul.bf16.vlgmr.msra.gmra.mxu3 %v276_v42 }
 0x1a5   :  { %v273_v43 = vpop.f32.mrf.mxu2 }
 0x227   :  { %v354_v45 = vpop.f32.mrf.mxu3 }
 0x228   :  { %v355_v46 = vadd.f32 %v513_v44, %v354_v45 }
 0x22a   :  { %359 = vst.msk [vmem:[#allocation8] sm:$0xff] %vm358_vm1, %v355_v46 }
 0x22b   :  { %370 = dma.vmem_to_hbm [thread:$0]  %s366_s14, 128, %s368_s17, [#allocation4]  }
 0x22f   :  { %v356_v47 = vpop.f32.mrf.mxu3 }
 0x230   :  { %614 = dma.done.wait [#allocation4], 128  }
 0x231   :  { %615 = vsyncadd [#allocation4], 4294967168 }
 0x232   :  { %375 = vsyncpa [#allocation3], 1 }
 0x233   :  { %376 = vsyncpa [#allocation6], 1 }
 0x234   :  { %377 = vsyncpa [#allocation4], 1 }

</bundles_post_ra>
